<compile_context>
chip_gen: v5e
topology: v5e:2x2
jax: 0.10.0
libtpu: 0.0.40
codegen_flags: <defaults>
</compile_context>

<pallas_src>
import jax
import jax.numpy as jnp
from jax import lax
from jax.experimental import pallas as pl
from jax.experimental.pallas import tpu as pltpu


def _noise_matrix_kernel(scale_ref, w_ref, out_ref):
    w = w_ref[...]
    eps_sq = jnp.float32(1e-24)  # (PyTorch F.normalize eps = 1e-12) ** 2

    # F.normalize(W.T, dim=0) == normalize the rows of W along the lane axis.
    inv_row = lax.rsqrt(
        jnp.maximum(jnp.sum(w * w, axis=-1, keepdims=True), eps_sq)
    )
    wn = w * inv_row

    # F.normalize(., dim=1) on W.T == normalize the columns of wn (axis=0).
    inv_col = lax.rsqrt(
        jnp.maximum(jnp.sum(wn * wn, axis=0, keepdims=True), eps_sq)
    )

    # Fold scale into the (1, C) factor; one final transpose gives W.T layout.
    out_ref[...] = (wn * (inv_col * scale_ref[0])).T


def noise_matrix_layer_forward(x, weight, scale=1.0):
    """Pallas implementation of NoiseMatrixLayer.forward.

    Args:
      x: ignored (the PyTorch forward never uses its input); kept for parity.
      weight: (C, C) float32 -- the nn.Linear weight.
      scale: python float or scalar jnp value (runtime scalar, no recompile).
    Returns:
      (C, C) float32 noise matrix.
    """
    del x  # forward() never uses its input
    C = weight.shape[0]
    scale_arr = jnp.asarray(scale, jnp.float32).reshape(1)

    # Single-buffered W + out footprint; raise the scoped VMEM limit only when
    # the default (32 MiB) would not hold the full-array blocks.
    # TODO(synk): for very large C (> ~2K f32 on v7x's 64 MiB VMEM) switch to a
    # row-tiled two-pass variant with a "parallel" grid axis across TCs.
    need_bytes = 2 * 4 * C * C + (4 << 20)
    compiler_params = None
    if need_bytes > (32 << 20):
        compiler_params = pltpu.CompilerParams(vmem_limit_bytes=need_bytes)

    return pl.pallas_call(
        _noise_matrix_kernel,
        out_shape=jax.ShapeDtypeStruct((C, C), jnp.float32),
        in_specs=[
            pl.BlockSpec(memory_space=pltpu.MemorySpace.SMEM),   # scale scalar
            pl.BlockSpec(memory_space=pltpu.MemorySpace.VMEM),   # full W block
        ],
        out_specs=pl.BlockSpec(memory_space=pltpu.MemorySpace.VMEM),
        compiler_params=compiler_params,
    )(scale_arr, weight)


def _reference(weight, scale):
    # Direct translation of the PyTorch module's math.
    m = weight.T  # eye @ W.T
    m = m / jnp.maximum(
        jnp.sqrt(jnp.sum(m * m, axis=0, keepdims=True)), 1e-12
    )
    m = m / jnp.maximum(
        jnp.sqrt(jnp.sum(m * m, axis=1, keepdims=True)), 1e-12
    )
    return m * scale


if __name__ == "__main__":
    num_classes = 16
    batch = 8
    scale = 2.0

    key = jax.random.PRNGKey(0)
    kx, kw = jax.random.split(key)

    # Deterministic params matching __init__: weight = eye(num_classes),
    # perturbed slightly so normalization is non-trivially exercised.
    weight = jnp.eye(num_classes, dtype=jnp.float32)
    weight = weight + 0.01 * jax.random.normal(
        kw, (num_classes, num_classes), dtype=jnp.float32
    )

    # Input x (logits-shaped); unused by forward, provided for parity.
    x = jax.random.normal(kx, (batch, num_classes), dtype=jnp.float32)

    out = noise_matrix_layer_forward(x, weight, scale=scale)
    out = jax.block_until_ready(out)

    ref = jax.block_until_ready(_reference(weight, scale))
    assert out.shape == (num_classes, num_classes)
    assert jnp.allclose(out, ref, atol=1e-5, rtol=1e-5)

    print("KERNEL_OK")
</pallas_src>

<mosaic_0001>
module attributes {stable_mosaic.version = 11 : i64} {
  func.func @_noise_matrix_kernel(%arg0: memref<1xf32, #tpu.memory_space<smem>>, %arg1: memref<16x16xf32, #tpu.memory_space<vmem>>, %arg2: memref<16x16xf32, #tpu.memory_space<vmem>>) attributes {dimension_semantics = [], scalar_prefetch = 0 : i64, scratch_operands = 0 : i64, tpu.core_type = #tpu.core_type<tc>} {
    %c0 = arith.constant 0 : index
    %c0_0 = arith.constant 0 : index
    %0 = vector.load %arg1[%c0, %c0_0] : memref<16x16xf32, #tpu.memory_space<vmem>>, vector<16x16xf32>
    %1 = arith.mulf %0, %0 : vector<16x16xf32>
    %cst = arith.constant dense<0.000000e+00> : vector<16xf32>
    %2 = vector.multi_reduction <add>, %1, %cst [1] : vector<16x16xf32> to vector<16xf32>
    %3 = vector.shape_cast %2 : vector<16xf32> to vector<16x1xf32>
    %cst_1 = arith.constant 1.000000e-24 : f32
    %4 = vector.broadcast %cst_1 : f32 to vector<16x1xf32>
    %5 = arith.maximumf %3, %4 : vector<16x1xf32>
    %6 = math.rsqrt %5 : vector<16x1xf32>
    %7 = vector.broadcast %6 : vector<16x1xf32> to vector<16x16xf32>
    %8 = arith.mulf %0, %7 : vector<16x16xf32>
    %9 = arith.mulf %8, %8 : vector<16x16xf32>
    %cst_2 = arith.constant dense<0.000000e+00> : vector<16xf32>
    %10 = vector.multi_reduction <add>, %9, %cst_2 [0] : vector<16x16xf32> to vector<16xf32>
    %11 = vector.shape_cast %10 : vector<16xf32> to vector<1x16xf32>
    %cst_3 = arith.constant 1.000000e-24 : f32
    %12 = vector.broadcast %cst_3 : f32 to vector<1x16xf32>
    %13 = arith.maximumf %11, %12 : vector<1x16xf32>
    %14 = math.rsqrt %13 : vector<1x16xf32>
    %c0_4 = arith.constant 0 : index
    %15 = memref.load %arg0[%c0_4] : memref<1xf32, #tpu.memory_space<smem>>
    %16 = vector.broadcast %15 : f32 to vector<1x16xf32>
    %17 = arith.mulf %14, %16 : vector<1x16xf32>
    %18 = vector.broadcast %17 : vector<1x16xf32> to vector<16x16xf32>
    %19 = arith.mulf %8, %18 : vector<16x16xf32>
    %20 = tpu.transpose %19, [1, 0] : vector<16x16xf32> -> vector<16x16xf32>
    %c0_5 = arith.constant 0 : index
    %c0_6 = arith.constant 0 : index
    %21 = vector.load %arg2[%c0_5, %c0_6] : memref<16x16xf32, #tpu.memory_space<vmem>>, vector<16x16xf32>
    tpu.vector_store %arg2[%c0_5, %c0_6], %20 {strides = array<i32>} : memref<16x16xf32, #tpu.memory_space<vmem>>, vector<16x16xf32>,
    return
  }
}

</mosaic_0001>

<bundles_post_ra>
// kernel: tpu_custom_call.1
= control target key start
LH: loop header
LB: loop body
LE: loop exit
PB: predicated region body
PF: predicated region fallthrough
CT: control target
= control target key end

     0   :  { %8 = vsyncpa [#allocation4], 0  ;;  %s247_s0 = inlined_call_operand.<no memory space> [shape: f32[1], index: 0, kind: input, shape index: {}]   ;;  %s248_s1 = inlined_call_operand.hbm [shape: f32[16,16], index: 1, kind: input, shape index: {}]   ;;  %s249_s2 = inlined_call_operand.hbm [shape: f32[16,16], index: 2, kind: output, shape index: {}]  }
   0x1   :  { %9 = vsyncpa [#allocation5], 0  ;;  %s16_s11 = sshll.u32 %s248_s1, 4  ;;  %s207_s12 = smov [#allocation3]   ;;  %s17_s11 = int_to_ptr.hbm [resolvable:$true] %s16_s11 }
   0x2   :  { %s18_s13 = sshll.u32 %s207_s12, 4  ;;  %s208_s14 = smov 128   ;;  %s19_s13 = int_to_ptr.vmem [resolvable:$true] %s18_s13 }
   0x3   :  { %s209_s15 = smov 8  }
   0x4   :  { %24 = dma.hbm_to_vmem [thread:$0]  %s17_s11, 256, %s19_s13, [#allocation4], %s208_s14, %s208_s14, %s209_s15  }
   0x5   :  { %203 = dma.done.wait [#allocation4], 256  }
   0x6   :  { %204 = vsyncadd [#allocation4], 4294967040  ;;  %v29_v0 = vld [vmem:[#allocation3] sm:$0xff]  ;;  %vm33_vm0 = vcmask 130048   ;;  %v30_v2 = vld [vmem:[#allocation3 + $0x8] sm:$0xff]  ;;  %v87_v44 = vstv %s247_s0  ;;  %s210_s17 = smov [#allocation6]  }
   0x7   :  { %v31_v1 = vmul.f32 %v29_v0, %v29_v0  ;;  %v32_v4 = vmul.f32 %v30_v2, %v30_v2  ;;  %s129_s18 = sshll.u32 %s210_s17, 4  ;;  %s131_s21 = sshll.u32 %s249_s2, 4  ;;  %s130_s18 = int_to_ptr.vmem [resolvable:$true] %s129_s18  ;;  %s132_s21 = int_to_ptr.hbm [resolvable:$true] %s131_s21 }
   0x9   :  { %v34_v3 = vsel %vm33_vm0, %v31_v1, 0.0  ;;  %v37_v5 = vsel %vm33_vm0, %v32_v4, 0.0 }
   0xa   :  { %35 = vadd.xlane.f32.xlu0 %v34_v3 }
  0x12   :  { %38 = vadd.xlane.f32.xlu0 %v37_v5 }
  0x7d   :  { %v36_v6 = vpop.xlane.xlu0 %35 }
  0x7e   :  { %v40_v7 = vmax.f32 %v36_v6, 1e-24 }
  0x80   :  { %149 = vrsqrt.f32 %v40_v7  ;;  %vm48_vm2 = vweird.f32 %v40_v7 }
  0x85   :  { %v39_v8 = vpop.xlane.xlu0 %38 }
  0x86   :  { %v150_v9 = vpop.eup %149  ;;  %v41_v10 = vmax.f32 %v39_v8, 1e-24 }
  0x87   :  { %v43_v11 = vmul.f32 %v150_v9, %v40_v7  ;;  %vm49_vm1 = vweird.f32 %v150_v9 }
  0x88   :  { %151 = vrsqrt.f32 %v41_v10  ;;  %vm50_vm3 = vmor %vm48_vm2, %vm49_vm1  ;;  %vm58_vm5 = vweird.f32 %v41_v10 }
  0x89   :  { %v44_v12 = vmul.f32 %v150_v9, %v43_v11 }
  0x8b   :  { %v45_v13 = vmul.f32 0.5, %v44_v12 }
  0x8d   :  { %v46_v14 = vsub.f32 1.5, %v45_v13 }
  0x8e   :  { %v152_v15 = vpop.eup %151 }
  0x8f   :  { %v53_v16 = vmul.f32 %v152_v15, %v41_v10  ;;  %v47_v17 = vmul.f32 %v150_v9, %v46_v14  ;;  %vm59_vm4 = vweird.f32 %v152_v15 }
  0x90   :  { %vm60_vm6 = vmor %vm58_vm5, %vm59_vm4 }
  0x91   :  { %v54_v18 = vmul.f32 %v152_v15, %v53_v16  ;;  %v51_v20 = vsel %vm50_vm3, %v150_v9, %v47_v17 }
  0x92   :  { %v62_v22 = vmul.f32 %v51_v20, %v29_v0 }
  0x93   :  { %v55_v19 = vmul.f32 0.5, %v54_v18 }
  0x94   :  { %v64_v26 = vmul.f32 %v62_v22, %v62_v22 }
  0x95   :  { %v56_v21 = vsub.f32 1.5, %v55_v19 }
  0x96   :  { %v66_v28 = vsel %vm33_vm0, %v64_v26, 0.0 }
  0x97   :  { %v57_v23 = vmul.f32 %v152_v15, %v56_v21 }
  0x99   :  { %v61_v24 = vsel %vm60_vm6, %v152_v15, %v57_v23 }
  0x9a   :  { %v63_v25 = vmul.f32 %v61_v24, %v30_v2 }
  0x9c   :  { %v65_v27 = vmul.f32 %v63_v25, %v63_v25 }
  0x9e   :  { %v67_v29 = vsel %vm33_vm0, %v65_v27, 0.0 }
  0x9f   :  { %v68_v30 = vadd.f32 %v67_v29, %v66_v28 }
  0xa1   :  { %v69_v31 = vrot.slane %v68_v30, 4 }
  0xa3   :  { %v70_v32 = vadd.f32 %v69_v31, %v68_v30 }
  0xa5   :  { %v71_v33 = vrot.slane %v70_v32, 2 }
  0xa7   :  { %v72_v34 = vadd.f32 %v71_v33, %v70_v32 }
  0xa9   :  { %v73_v35 = vrot.slane %v72_v34, 1 }
  0xab   :  { %v74_v36 = vadd.f32 %v73_v35, %v72_v34 }
  0xad   :  { %v75_v37 = vmax.f32 %v74_v36, 1e-24 }
  0xaf   :  { %153 = vrsqrt.f32 %v75_v37  ;;  %vm82_vm8 = vweird.f32 %v75_v37 }
  0xb5   :  { %v154_v38 = vpop.eup %153 }
  0xb6   :  { %v77_v39 = vmul.f32 %v154_v38, %v75_v37  ;;  %vm83_vm7 = vweird.f32 %v154_v38 }
  0xb7   :  { %vm84_vm9 = vmor %vm82_vm8, %vm83_vm7 }
  0xb8   :  { %v78_v40 = vmul.f32 %v154_v38, %v77_v39 }
  0xba   :  { %v79_v41 = vmul.f32 0.5, %v78_v40 }
  0xbc   :  { %v80_v42 = vsub.f32 1.5, %v79_v41 }
  0xbe   :  { %v81_v43 = vmul.f32 %v154_v38, %v80_v42 }
  0xc0   :  { %v85_v45 = vsel %vm84_vm9, %v154_v38, %v81_v43 }
  0xc1   :  { %v88_v46 = vmul.f32 %v87_v44, %v85_v45 }
  0xc3   :  { %v89_v47 = vmul.f32 %v88_v46, %v62_v22  ;;  %v90_v48 = vmul.f32 %v88_v46, %v63_v25 }
  0xc5   :  { %91 = vxpose.xlu1.b32.start [1/2] (short) (narrow) %v89_v47, 16 }
  0xcd   :  { %92 = vxpose.xlu1.b32.end [2/2] (short) (narrow) %v90_v48, 16 }
 0x169   :  { %v107_v49 = vpop.trf.xlu1 }
 0x16a   :  { %123 = vst.msk [vmem:[#allocation6] sm:$0xff] %vm33_vm0, %v107_v49 }
 0x171   :  { %v108_v50 = vpop.trf.xlu1 }
 0x172   :  { %124 = vst.msk [vmem:[#allocation6 + $0x8] sm:$0xff] %vm33_vm0, %v108_v50 }
 0x173   :  { %137 = dma.vmem_to_hbm [thread:$0]  %s130_s18, 256, %s132_s21, [#allocation5], %s208_s14, %s208_s14, %s209_s15  }
 0x174   :  { %205 = dma.done.wait [#allocation5], 256  }
 0x175   :  { %206 = vsyncadd [#allocation5], 4294967040 }
 0x176   :  { %142 = vsyncpa [#allocation4], 1 }
 0x177   :  { %143 = vsyncpa [#allocation5], 1 }

</bundles_post_ra>
